<compile_context>
chip_gen: v5e
topology: v5e:2x2
jax: 0.10.0
libtpu: 0.0.40
codegen_flags: <defaults>
</compile_context>

<pallas_src>
import math
import functools

import jax
import jax.numpy as jnp
from jax.experimental import pallas as pl
from jax.experimental.pallas import tpu as pltpu


def build_pe_table(d_model: int, max_len: int = 5000) -> jnp.ndarray:
    """Deterministic positional-encoding buffer, identical to the torch init."""
    position = jnp.arange(0, max_len, dtype=jnp.float32)[:, None]          # [L, 1]
    div_term = jnp.exp(
        jnp.arange(0, d_model, 2, dtype=jnp.float32) * (-math.log(10000.0) / d_model)
    )                                                                       # [D/2]
    pe = jnp.zeros((max_len, d_model), dtype=jnp.float32)
    pe = pe.at[:, 0::2].set(jnp.sin(position * div_term))
    pe = pe.at[:, 1::2].set(jnp.cos(position * div_term))
    return pe                                                               # [L, D]


# ----------------------------- kernels --------------------------------------


def _pe_add_kernel(x_ref, pe_ref, o_ref):
    # x_ref: (TB, TN), pe_ref: (1, TN) -> sublane-broadcast over the batch tile.
    o_ref[...] = (x_ref[...] + pe_ref[...]).astype(o_ref.dtype)


def _pe_add_dropout_kernel(x_ref, pe_ref, bits_ref, o_ref, *, threshold: int, scale: float):
    # TODO(synk): dropout mask is not bit-identical to torch.nn.Dropout's RNG stream
    # (statistically equivalent inverted dropout driven by jax.random bits).
    y = x_ref[...] + pe_ref[...]
    bits = bits_ref[...]
    # Integer-threshold dropout on the low 31 bits (uniform on [0, 2^31)):
    # no float convert / mul in the mask path.
    r = bits & jnp.asarray(0x7FFFFFFF, dtype=bits.dtype)
    keep = r >= jnp.asarray(threshold, dtype=bits.dtype)
    o_ref[...] = jnp.where(keep, y * scale, jnp.zeros_like(y)).astype(o_ref.dtype)


# ----------------------------- tiling ---------------------------------------


def _select_tiles(B, N, itemsize, with_bits, budget_bytes):
    """Pick (TB, TN) for blocks over the [B, N] view from a VMEM byte budget."""
    bits_bytes = 4 if with_bits else 0

    def step_bytes(tb, tn):
        # x block + out block + pe block (+ dropout bits block), each stream
        # double-buffered by the BlockSpec pipeline.
        return 2 * (tb * tn * itemsize          # x
                    + tb * tn * itemsize        # out
                    + tn * itemsize             # pe (broadcast over batch)
                    + tb * tn * bits_bytes)     # dropout random bits

    if step_bytes(B, N) <= budget_bytes:
        tb, tn = B, N
    elif N % 128 == 0:
        # Keep the whole batch in the block, tile the lane-dense last dim.
        tb = B
        per_col = 2 * (2 * tb * itemsize + itemsize + tb * bits_bytes)
        tn = max(128, (budget_bytes // per_col) // 128 * 128)
        tn = min(tn, N)
        while N % tn != 0:          # keep tiles uniform; terminates at 128
            tn -= 128
    else:
        # Last dim not lane-alignable: keep it whole, tile the batch (mult of 8).
        tn = N
        per_row = 2 * (2 * tn * itemsize + tn * bits_bytes)
        avail = max(budget_bytes - 2 * tn * itemsize, 0)
        tb = avail // max(per_row, 1)
        tb = min(B, max(8, (tb // 8) * 8)) if B >= 8 else B

    # v7x has 2 TensorCores: make sure a 'parallel' axis has >= 2 blocks.
    if pl.cdiv(N, tn) * pl.cdiv(B, tb) == 1:
        if N >= 256 and (N // 2) % 128 == 0:
            tn = N // 2
        elif B % 16 == 0:
            tb = B // 2

    return tb, tn, step_bytes(tb, tn)


# ----------------------------- wrapper ---------------------------------------


def positional_encoding(x, pe_table, *, dropout_rate=0.1, training=False,
                        rng_key=None, vmem_budget_bytes=12 * 1024 * 1024):
    """x: [B, S, D].  Returns x + pe[:S] (with inverted dropout if training)."""
    B, S, D = x.shape
    max_len = pe_table.shape[0]
    if S > max_len:
        raise ValueError(f"sequence length {S} exceeds positional table max_len {max_len}")

    apply_dropout = bool(training) and float(dropout_rate) > 0.0

    # Flatten (S, D) -> N so stores are lane-dense even for small / odd d_model.
    N = S * D
    itemsize = x.dtype.itemsize
    pe2 = pe_table[:S, :].astype(x.dtype).reshape(1, N)
    x2 = x.reshape(B, N)

    tb, tn, vmem_bytes = _select_tiles(B, N, itemsize, apply_dropout, vmem_budget_bytes)
    grid = (pl.cdiv(N, tn), pl.cdiv(B, tb))   # batch innermost -> pe tile DMA reused

    x_spec = pl.BlockSpec((tb, tn), lambda n, b: (b, n))
    # TODO(synk): pipeline_mode=pl.Buffered(1) on the pe spec would save one pe tile
    # of VMEM on v7x; omitted to keep the kernel portable across jax versions.
    pe_spec = pl.BlockSpec((1, tn), lambda n, b: (0, n))
    bits_spec = pl.BlockSpec((tb, tn), lambda n, b: (b, n))
    out_spec = pl.BlockSpec((tb, tn), lambda n, b: (b, n))

    compiler_params = pltpu.CompilerParams(
        dimension_semantics=("parallel", "parallel"),
        vmem_limit_bytes=int(min(max(vmem_bytes + (2 << 20), 16 << 20), 48 << 20)),
    )

    if not apply_dropout:
        out2 = pl.pallas_call(
            _pe_add_kernel,
            out_shape=jax.ShapeDtypeStruct((B, N), x.dtype),
            grid_spec=pltpu.PrefetchScalarGridSpec(
                num_scalar_prefetch=0,
                grid=grid,
                in_specs=[x_spec, pe_spec],
                out_specs=out_spec,
            ),
            compiler_params=compiler_params,
            input_output_aliases={0: 0},   # write result in place over x's buffer
        )(x2, pe2)
        return out2.reshape(B, S, D)

    if rng_key is None:
        rng_key = jax.random.PRNGKey(0)
    rate = float(dropout_rate)
    threshold = int(round(rate * float(1 << 31)))   # drop iff low31(bits) < threshold
    scale = 1.0 / (1.0 - rate)

    # TODO(synk): the in-kernel hardware PRNG (pltpu.prng_seed / prng_random_bits)
    # would avoid streaming these mask bits from HBM, but it only lowers on real TPU
    # (not in CPU interpret mode), so the bits are generated outside the kernel.
    bits2 = jax.random.bits(rng_key, (B, N), dtype=jnp.uint32)

    kernel = functools.partial(_pe_add_dropout_kernel, threshold=threshold, scale=scale)
    out2 = pl.pallas_call(
        kernel,
        out_shape=jax.ShapeDtypeStruct((B, N), x.dtype),
        grid_spec=pltpu.PrefetchScalarGridSpec(
            num_scalar_prefetch=0,
            grid=grid,
            in_specs=[x_spec, pe_spec, bits_spec],
            out_specs=out_spec,
        ),
        compiler_params=compiler_params,
        input_output_aliases={0: 0},   # x -> out in place
    )(x2, pe2, bits2)
    return out2.reshape(B, S, D)


# ----------------------------- demo / checks ---------------------------------


if __name__ == "__main__":
    B, S, D = 2, 8, 32
    key = jax.random.PRNGKey(0)
    x = jax.random.normal(key, (B, S, D), dtype=jnp.float32)
    pe_table = build_pe_table(d_model=D, max_len=5000)

    # Eval-mode forward (dropout is identity) — matches module.eval() semantics.
    out = positional_encoding(x, pe_table, dropout_rate=0.1, training=False)
    out = jax.block_until_ready(out)
    ref = x + pe_table[None, :S, :]
    assert jnp.allclose(out, ref, atol=1e-6), "eval-mode mismatch vs reference"

    # bf16, larger shape, artificially small VMEM budget to exercise the tiled path.
    B2, S2, D2 = 4, 64, 128
    x16 = jax.random.normal(jax.random.PRNGKey(1), (B2, S2, D2), dtype=jnp.bfloat16)
    pe_table2 = build_pe_table(d_model=D2, max_len=5000)
    out16 = positional_encoding(x16, pe_table2, training=False,
                                vmem_budget_bytes=256 * 1024)
    out16 = jax.block_until_ready(out16)
    ref16 = x16 + pe_table2[None, :S2, :].astype(jnp.bfloat16)
    assert jnp.allclose(out16.astype(jnp.float32), ref16.astype(jnp.float32),
                        atol=1e-2, rtol=1e-2), "bf16 tiled-path mismatch"

    # Training-mode forward: exact check against the same mask bits.
    rate = 0.1
    drop_key = jax.random.PRNGKey(1234)
    out_tr = positional_encoding(x, pe_table, dropout_rate=rate, training=True,
                                 rng_key=drop_key)
    out_tr = jax.block_until_ready(out_tr)
    assert out_tr.shape == (B, S, D)

    bits = jax.random.bits(drop_key, (B, S * D), dtype=jnp.uint32).reshape(B, S, D)
    threshold = int(round(rate * float(1 << 31)))
    keep = (bits & jnp.uint32(0x7FFFFFFF)) >= jnp.uint32(threshold)
    ref_tr = jnp.where(keep, ref / (1.0 - rate), 0.0)
    assert jnp.allclose(out_tr, ref_tr, atol=1e-5), "training-mode mismatch"

    print("KERNEL_OK")
</pallas_src>

<mosaic_0001>
module attributes {stable_mosaic.version = 11 : i64} {
  func.func @_pe_add_kernel(%arg0: i32, %arg1: i32, %arg2: memref<2x128xf32, #tpu.memory_space<vmem>>, %arg3: memref<1x128xf32, #tpu.memory_space<vmem>>, %arg4: memref<2x128xf32, #tpu.memory_space<vmem>>) attributes {dimension_semantics = [#tpu.dimension_semantics<parallel>, #tpu.dimension_semantics<parallel>], iteration_bounds = array<i64: 2, 1>, scalar_prefetch = 0 : i64, scratch_operands = 0 : i64, tpu.core_type = #tpu.core_type<tc>, window_params = [{transform_indices = @transform_0, window_bounds = array<i64: 2, 128>}, {transform_indices = @transform_1, window_bounds = array<i64: 1, 128>}, {transform_indices = @transform_2, window_bounds = array<i64: 2, 128>}]} {
    %c0 = arith.constant 0 : index
    %c0_0 = arith.constant 0 : index
    %0 = vector.load %arg2[%c0, %c0_0] : memref<2x128xf32, #tpu.memory_space<vmem>>, vector<2x128xf32>
    %c0_1 = arith.constant 0 : index
    %c0_2 = arith.constant 0 : index
    %1 = vector.load %arg3[%c0_1, %c0_2] : memref<1x128xf32, #tpu.memory_space<vmem>>, vector<1x128xf32>
    %2 = vector.broadcast %1 : vector<1x128xf32> to vector<2x128xf32>
    %3 = arith.addf %0, %2 : vector<2x128xf32>
    %c0_3 = arith.constant 0 : index
    %c0_4 = arith.constant 0 : index
    %4 = vector.load %arg4[%c0_3, %c0_4] : memref<2x128xf32, #tpu.memory_space<vmem>>, vector<2x128xf32>
    tpu.vector_store %arg4[%c0_3, %c0_4], %3 {strides = array<i32>} : memref<2x128xf32, #tpu.memory_space<vmem>>, vector<2x128xf32>,
    return
  }
  func.func @transform_0(%arg0: i32, %arg1: i32) -> (i32, i32) {
    %c0_i32 = arith.constant 0 : i32
    return %arg1, %arg0 : i32, i32
  }
  func.func @transform_1(%arg0: i32, %arg1: i32) -> (i32, i32) {
    %c0_i32 = arith.constant 0 : i32
    %c0_i32_0 = arith.constant 0 : i32
    return %c0_i32, %arg0 : i32, i32
  }
  func.func @transform_2(%arg0: i32, %arg1: i32) -> (i32, i32) {
    %c0_i32 = arith.constant 0 : i32
    return %arg1, %arg0 : i32, i32
  }
}

</mosaic_0001>

<bundles_post_ra>
// kernel: tpu_custom_call.1
= control target key start
LH: loop header
LB: loop body
LE: loop exit
PB: predicated region body
PF: predicated region fallthrough
CT: control target
= control target key end

     0   :  { %7 = vsyncpa [#allocation3], 0  ;;  %s639_s0 = inlined_call_operand.hbm [shape: f32[2,256], index: 0, kind: input, shape index: {}, may-alias: {0,2}]   ;;  %s640_s1 = inlined_call_operand.vmem [shape: f32[1,256], index: 1, kind: input, shape index: {}]   ;;  %s641_s2 = inlined_call_operand.hbm [shape: f32[2,256], index: 2, kind: output, shape index: {}, may-alias: {0,2}]  }
   0x1   :  { %9 = vsyncpa [#allocation3 + $0x1], 0 }
   0x2   :  { %10 = vsyncpa [#allocation4], 0 }
   0x3   :  { %12 = vsyncpa [#allocation4 + $0x1], 0  ;;  %s514_s9 = smov 0   ;;  %s516_s10 = smov 0  }
   0x4   :  { %s518_s11 = smov 0   ;;  %s520_s12 = smov 0  }
   0x5   :  { %s522_s13 = smov 0   ;;  %s524_s14 = smov 0  }
   0x6 LB: > { %s309_s15 = sadd.s32 4294967295, %s497_s14   ;;  %s310_s16 = sadd.s32 4294967294, %s497_s14   ;;  %s497_s14 = sphi %s524_s14, %s18_s14   ;;  %s493_s13 = sphi %s522_s13, %s650_s13   ;;  %s489_s12 = sphi %s520_s12, %s649_s12   ;;  %s485_s11 = sphi %s518_s11, %s648_s11   ;;  %s481_s10 = sphi %s516_s10, %s647_s10   ;;  %s477_s9 = sphi %s514_s9, %s646_s9  }
   0x7   : > { %s30_s17 = sadd.s32 1, %s493_s13  ;;  %s39_s18 = sadd.s32 1, %s485_s11 }
   0x8   : > { %p32_p0 = scmp.ge.s32.totalorder %s30_s17, 2  ;;  %p46_p1 = scmp.ne.s32.totalorder %s485_s11, %s481_s10 }
   0x9   : > { %p47_p2 = scmp.eq.s32.totalorder %s497_s14, 0  ;;  %p52_p3 = scmp.ne.s32.totalorder %s481_s10, %s477_s9 }
   0xa   : > { %s652_s17 = smov (%p32_p0, %s30_s17), 0  ;;  %p53_p5 = scmp.eq.s32.totalorder %s309_s15, 0 }
   0xb   : > { %p555_p4 = por %p47_p2, %p46_p1  ;;  %s35_s20 = ssub.s32 %s493_s13, %s652_s17 }
   0xc   : > { %p104_p6 = scmp.eq.s32.totalorder %s309_s15, 1  ;;  %p37_p7 = scmp.eq.s32.totalorder %s35_s20, 0 }
   0xd   : > { %p561_p8 = por %p53_p5, %p52_p3  ;;  %p110_p10 = scmp.eq.s32.totalorder %s310_s16, 1 }
   0xe   : > { %p565_p9 = por %p104_p6, %p46_p1  ;;  %p312_p12 = scmp.ge.s32.totalorder %s497_s14, 2 }
   0xf   : > { %s570_s23 = scalar_select %p37_p7, %s485_s11, %s39_s18  }
  0x10   : > { %p572_p11 = por %p110_p10, %p52_p3  ;;  %p334_p13 = scmp.lt.s32.totalorder %s497_s14, 2 }
  0x11   : > { %s130_s25 = sand.u32 1, %s485_s11   ;;  %s314_s27 = sshll.u32 %s493_s13, 1 }
  0x12   : > { %s313_s26 = sshll.u32 %s130_s25, 1  ;;  %s140_s30 = scalar_lea.hbm %s639_s0, %s314_s27 }
  0x13   : > { %s134_s3 = scalar_lea.vmem [#allocation2], %s313_s26  ;;  %s142_s5 = sshll.u32 %s140_s30, 4  ;;  %s143_s5 = int_to_ptr.hbm [resolvable:$true] %s142_s5 }
  0x14   : > { %s144_s4 = sshll.u32 %s134_s3, 4  ;;  %p327_p0 = pnand %p334_p13, %p555_p4  ;;  %s145_s4 = int_to_ptr.vmem [resolvable:$true] %s144_s4 }
  0x15   : > { %p315_p1 = scmp.ge.s32.totalorder %s497_s14, 1  ;;  %p155_p2 = scmp.lt.s32.totalorder %s497_s14, 3 }
  0x16   : > { %s131_s6 = scalar_lea.sflag [#allocation3], %s130_s25 }
  0x17   : > { %329 = dma.hbm_to_vmem [thread:$0]  (!%p327_p0), %s143_s5, 32, %s145_s4, %s131_s6  }
  0x18   : > { %p156_p3 = pnand %p315_p1, %p155_p2 }
  0x19   : > { %s588_s7 = sand.u32 (!%p156_p3), 1, %s481_s10  }
  0x1a   : > { %159 = sbr.rel (%p156_p3) target bundleno = 49 (0x31), region = 28  ;;  %s316_s8 = sshll.u32 (!%p156_p3), %s588_s7, 1 }
  0x1b   : > { %s162_s15 = scalar_lea.sflag (!%p156_p3), [#allocation3], %s588_s7  ;;  %s165_s16 = scalar_lea.vmem (!%p156_p3), [#allocation2], %s316_s8 }
  0x1f   : > { %468 = dma.done.wait (%p561_p8), %s162_s15, 32  }
  0x20   : > { %470 = vsyncadd (%p561_p8), %s162_s15, 4294967264  ;;  %p190_p4 = scmp.lt.s32.totalorder %s489_s12, 1  ;;  %s319_s19 = sshll.u32 %s489_s12, 1  ;;  %v193_v0 = vld [vmem:[%s165_s16] sm:$0x3] }
  0x21   : > { %s213_s29 = scalar_lea.hbm %s641_s2, %s319_s19  ;;  %s189_s30 = scalar_lea.vmem [#allocation5], %s316_s8 }
  0x22   : > { %s191_s18 = scalar_select %p190_p4, %s489_s12, 1 }
  0x23   : > { %s215_s3 = sshll.u32 %s189_s30, 4  ;;  %s217_s21 = sshll.u32 %s213_s29, 4  ;;  %s216_s3 = int_to_ptr.vmem [resolvable:$true] %s215_s3  ;;  %s218_s21 = int_to_ptr.hbm [resolvable:$true] %s217_s21 }
  0x24   : > { %s192_s26 = scalar_lea.vmem %s640_s1, %s191_s18  ;;  %s201_s4 = scalar_lea.sflag [#allocation4], %s588_s7 }
  0x25   : > { %v384_v1 = vld [vmem:[%s192_s26] ss:$0 sm:$0xff]  ;;  %s429_s12 = sshra.s32 %s218_s21, 4  ;;  %s435_s8 = scalar_lea.hbm %s641_s2, 4  ;;  %s430_s12 = int_to_ptr.hbm [resolvable:$true] %s429_s12 }
  0x26   : > { %v198_v2 = vadd.f32 %v384_v1, %v193_v0  ;;  %s431_s5 = scalar_lea.hbm %s430_s12, 2  ;;  %p436_p8 = scmp.lt.s32.totalorder %s430_s12, %s641_s2 }
  0x27   : > { %p432_p5 = scmp.ne.s32.totalorder %s430_s12, %s431_s5  ;;  %p437_p10 = scmp.lt.s32.totalorder %s435_s8, %s431_s5 }
  0x28   : > { %199 = vst [vmem:[%s189_s30] sm:$0x3] %v198_v2 }
  0x29   : > { %p433_p6 = pnand %p432_p5, %p565_p9  ;;  %p438_p13 = por %p437_p10, %p436_p8 }
  0x2b   : > { %p434_p7 = pneg %p433_p6 }
  0x2d   : > { %p439_p0 = pnand %p438_p13, %p434_p7 }
  0x2f   : > { %442 = shalt.err (!%p439_p0)
}
  0x30   : > { %324 = dma.vmem_to_hbm [thread:$0]  (%p565_p9), %s216_s3, 32, %s218_s21, %s201_s4  }
  0x31 PF: > { %s229_s7 = sand.u32 1, %s477_s9   ;;  %p331_p1 = pnand %p312_p12, %p572_p11 }
  0x32   : > { %s230_s16 = scalar_lea.sflag [#allocation4], %s229_s7 }
  0x33   : > { %p332_p2 = pneg %p331_p1 }
  0x35   : > { %472 = dma.done.wait (%p332_p2), %s230_s16, 32  }
  0x36   : > { %474 = vsyncadd (%p332_p2), %s230_s16, 4294967264  ;;  %s18_s14 = sadd.s32 1, %s497_s14   ;;  %s646_s9 = smov %s481_s10 }
  0x37   : > { %p15_p3 = scmp.ge.s32.totalorder %s18_s14, 4   ;;  %s647_s10 = smov %s485_s11 }
  0x38   : > { %s648_s11 = smov %s570_s23  ;;  %s649_s12 = smov %s493_s13 }
  0x39   : > { %s650_s13 = smov %s652_s17  ;;  %17 = sbr.rel (!%p15_p3) target bundleno = 6 (0x6), region = 76 }
  0x3e   :  { %236 = vsyncpa [#allocation3], 1 }
  0x3f   :  { %238 = vsyncpa [#allocation3 + $0x1], 1 }
  0x40   :  { %239 = vsyncpa [#allocation4], 1 }
  0x41   :  { %241 = vsyncpa [#allocation4 + $0x1], 1 }

</bundles_post_ra>
